<compile_context>
chip_gen: v7x
topology: tpu7x:2x2x1
jax: 0.10.0
libtpu: 0.0.40
codegen_flags: <defaults>
</compile_context>

<pallas_src>
import functools

import jax
import jax.numpy as jnp
from jax import lax
from jax.experimental import pallas as pl
from jax.experimental.pallas import tpu as pltpu


def _wiring_kernel(r_i2h_ref, r_i2h_emo_ref,
                   r_h2h_ref, r_h2h_emo_ref,
                   r_h2o_ref, r_h2o_da_ref, r_h2o_db_ref,
                   i2h_ref, h2h_ref, h2o_ref,
                   c_i2h_ref, c_h2h_ref, c_h2o_ref, *,
                   tile, input_size, hidden_size, output_size,
                   i2h_sp, h2h_sp, h2o_sp,
                   v_size, a_size, emotion_inputs, emotion_on):
    g = pl.program_id(0)

    def _count(m, valid):
        # Per-block reduction in "half units" (0.5 weak links count as 1).
        # f32 block sums are exact here (<< 2^24 per <=512-row block); the
        # cross-block accumulation happens in int32 in the jitted wrapper.
        return (jnp.sum(jnp.where(valid, 2.0 * m, 0.0))
                .astype(jnp.int32).reshape(1, 1, 1))

    # ---------- input -> hidden : column slab [g*tile, (g+1)*tile) ----------
    col = g * tile + lax.broadcasted_iota(jnp.int32, (1, tile), 1)        # (1,T)
    m = (r_i2h_ref[...] > i2h_sp).astype(jnp.float32)
    if emotion_on:
        irow = lax.broadcasted_iota(jnp.int32, (input_size, 1), 0)        # (I,1)
        hit = ((irow < emotion_inputs) & (col < (v_size + a_size))
               & (r_i2h_emo_ref[...] < 0.6))
        m = jnp.where(hit, 1.0, m)
    i2h_ref[...] = m
    c_i2h_ref[...] = _count(m, col < hidden_size)

    # ---------- hidden -> hidden : row slab [g*tile, (g+1)*tile) ------------
    hrow = g * tile + lax.broadcasted_iota(jnp.int32, (tile, 1), 0)       # (T,1)
    hcol = lax.broadcasted_iota(jnp.int32, (1, hidden_size), 1)           # (1,H)
    m = (r_h2h_ref[...] > h2h_sp).astype(jnp.float32)
    if emotion_on:
        emo = r_h2h_emo_ref[...]
        rv = hrow < v_size
        ra = (hrow >= v_size) & (hrow < v_size + a_size)
        rs = hrow >= (v_size + a_size)
        cv = hcol < v_size
        ca = (hcol >= v_size) & (hcol < v_size + a_size)
        cs = hcol >= (v_size + a_size)
        nd = hrow != hcol
        # collapsed where-chain: one probability-threshold map, one final select
        thr = jnp.where(((rv & cv) | (ra & ca)) & nd,
                        jnp.float32(0.4), jnp.float32(0.0))
        thr = jnp.where((rv & ca) | (ra & cv), jnp.float32(0.2), thr)
        thr = jnp.where((rs & (cv | ca)) | ((rv | ra) & cs),
                        jnp.float32(0.3), thr)
        m = jnp.where(emo < thr, 1.0, m)
    h2h_ref[...] = m
    valid_row = hrow < hidden_size
    c_h2h_ref[...] = _count(m, valid_row)

    # ---------- hidden -> output : row slab [g*tile, (g+1)*tile) ------------
    m = (r_h2o_ref[...] > h2o_sp).astype(jnp.float32)
    if emotion_on:
        ocol = lax.broadcasted_iota(jnp.int32, (1, output_size), 1)       # (1,O)
        d_a = r_h2o_da_ref[...]                                           # (T,1)
        d_b = r_h2o_db_ref[...]                                           # (T,1)

        v_reg = hrow < v_size
        a_reg = (hrow >= v_size) & (hrow < v_size + a_size)
        sh_reg = hrow >= (v_size + a_size)
        is_c0 = ocol == 0
        is_c1 = ocol == 1

        m = jnp.where(v_reg & is_c0, 1.0, m)
        m = jnp.where(v_reg & is_c1 & (d_a < 0.3), 0.5, m)
        m = jnp.where(a_reg & is_c1, 1.0, m)
        m = jnp.where(a_reg & is_c0 & (d_a < 0.3), 0.5, m)
        both = d_a < 0.8
        pick_v = d_b < 0.5
        m = jnp.where(sh_reg & both & (is_c0 | is_c1), 1.0, m)
        m = jnp.where(sh_reg & (~both)
                      & ((is_c0 & pick_v) | (is_c1 & (~pick_v))), 1.0, m)
    h2o_ref[...] = m
    c_h2o_ref[...] = _count(m, valid_row)


class NCPWiringPallas:
    """JAX/Pallas port of NCPWiring (wiring_type='random' path)."""

    def __init__(self, input_size, hidden_size, output_size,
                 sparsity_level=0.5, wiring_type='random',
                 heterogeneous=True, emotion_focused=True, seed=0):
        if wiring_type != 'random':
            raise NotImplementedError(
                "only wiring_type='random' is implemented as a Pallas kernel")

        self.input_size = input_size
        self.hidden_size = hidden_size
        self.output_size = output_size
        self.sparsity_level = sparsity_level
        self.wiring_type = wiring_type
        self.heterogeneous = heterogeneous
        self.emotion_focused = emotion_focused

        if heterogeneous:
            self.i2h_sparsity = max(0.1, sparsity_level - 0.2)
            self.h2h_sparsity = sparsity_level
            self.h2o_sparsity = min(0.9, sparsity_level + 0.1)
        else:
            self.i2h_sparsity = sparsity_level
            self.h2h_sparsity = sparsity_level
            self.h2o_sparsity = sparsity_level

        self.v_size = hidden_size // 3
        self.a_size = hidden_size // 3
        self.emotion_inputs = int(input_size * 0.2)
        emotion_on = bool(emotion_focused and output_size >= 2)

        # shared hidden-axis grid: rows of h2h/h2o and columns of i2h, <=512
        tile = hidden_size if hidden_size <= 512 else 512
        grid = pl.cdiv(hidden_size, tile)

        kernel = functools.partial(
            _wiring_kernel,
            tile=tile, input_size=input_size, hidden_size=hidden_size,
            output_size=output_size,
            i2h_sp=float(self.i2h_sparsity),
            h2h_sp=float(self.h2h_sparsity),
            h2o_sp=float(self.h2o_sparsity),
            v_size=self.v_size, a_size=self.a_size,
            emotion_inputs=self.emotion_inputs, emotion_on=emotion_on)

        fused = pl.pallas_call(
            kernel,
            out_shape=(
                jax.ShapeDtypeStruct((input_size, hidden_size), jnp.float32),
                jax.ShapeDtypeStruct((hidden_size, hidden_size), jnp.float32),
                jax.ShapeDtypeStruct((hidden_size, output_size), jnp.float32),
                jax.ShapeDtypeStruct((grid, 1, 1), jnp.int32),
                jax.ShapeDtypeStruct((grid, 1, 1), jnp.int32),
                jax.ShapeDtypeStruct((grid, 1, 1), jnp.int32),
            ),
            grid_spec=pltpu.PrefetchScalarGridSpec(
                num_scalar_prefetch=0,
                grid=(grid,),
                in_specs=[
                    pl.BlockSpec((input_size, tile), lambda g: (0, g)),
                    pl.BlockSpec((input_size, tile), lambda g: (0, g)),
                    pl.BlockSpec((tile, hidden_size), lambda g: (g, 0)),
                    pl.BlockSpec((tile, hidden_size), lambda g: (g, 0)),
                    pl.BlockSpec((tile, output_size), lambda g: (g, 0)),
                    pl.BlockSpec((tile, 1), lambda g: (g, 0)),
                    pl.BlockSpec((tile, 1), lambda g: (g, 0)),
                ],
                out_specs=(
                    pl.BlockSpec((input_size, tile), lambda g: (0, g)),
                    pl.BlockSpec((tile, hidden_size), lambda g: (g, 0)),
                    pl.BlockSpec((tile, output_size), lambda g: (g, 0)),
                    pl.BlockSpec((1, 1, 1), lambda g: (g, 0, 0)),
                    pl.BlockSpec((1, 1, 1), lambda g: (g, 0, 0)),
                    pl.BlockSpec((1, 1, 1), lambda g: (g, 0, 0)),
                ),
            ),
            compiler_params=pltpu.CompilerParams(
                # no output block is revisited across the grid axis -> safe to
                # shard across TensorCores
                dimension_semantics=("parallel",),
                # above the 32 MiB scoped default, safely below v7x's 64 MiB
                vmem_limit_bytes=48 * 1024 * 1024),
        )

        self.max_connections = (input_size * hidden_size
                                + hidden_size * hidden_size
                                + hidden_size * output_size)
        max_conn_f = float(self.max_connections)
        I, H, O = input_size, hidden_size, output_size

        def _run(key):
            ks = jax.random.split(key, 7)
            r_i2h = jax.random.uniform(ks[0], (I, H), jnp.float32)
            r_i2h_emo = jax.random.uniform(ks[1], (I, H), jnp.float32)
            r_h2h = jax.random.uniform(ks[2], (H, H), jnp.float32)
            r_h2h_emo = jax.random.uniform(ks[3], (H, H), jnp.float32)
            r_h2o = jax.random.uniform(ks[4], (H, O), jnp.float32)
            r_h2o_da = jax.random.uniform(ks[5], (H, 1), jnp.float32)
            r_h2o_db = jax.random.uniform(ks[6], (H, 1), jnp.float32)

            i2h, h2h, h2o, c1, c2, c3 = fused(
                r_i2h, r_i2h_emo, r_h2h, r_h2h_emo, r_h2o, r_h2o_da, r_h2o_db)
            half_units = jnp.sum(c1) + jnp.sum(c2) + jnp.sum(c3)   # exact int
            total = half_units.astype(jnp.float32) * 0.5
            sparsity = 1.0 - total / max_conn_f
            return i2h, h2h, h2o, total, sparsity

        self._run = jax.jit(_run)
        self._key = jax.random.PRNGKey(seed)

    def forward(self, x=None):
        i2h, h2h, h2o, total, sparsity = self._run(self._key)
        # stats stay as device scalars -> no device->host sync in forward()
        self.total_connections = total
        self.sparsity = sparsity
        return {'input_to_hidden': i2h,
                'hidden_to_hidden': h2h,
                'hidden_to_output': h2o}

    __call__ = forward


if __name__ == "__main__":
    input_size, hidden_size, output_size = 16, 32, 8

    # deterministic: wiring randoms derive from jax.random.PRNGKey(0)
    wiring = NCPWiringPallas(input_size, hidden_size, output_size,
                             sparsity_level=0.5, wiring_type='random',
                             heterogeneous=True, emotion_focused=True,
                             seed=0)

    masks = wiring.forward()
    masks = jax.block_until_ready(masks)

    assert masks['input_to_hidden'].shape == (input_size, hidden_size)
    assert masks['hidden_to_hidden'].shape == (hidden_size, hidden_size)
    assert masks['hidden_to_output'].shape == (hidden_size, output_size)
    for m in masks.values():
        assert m.dtype == jnp.float32
        vals = jnp.unique(m)
        assert bool(jnp.all((vals == 0.0) | (vals == 0.5) | (vals == 1.0)))

    # determinism: a second forward reproduces the same masks
    masks2 = jax.block_until_ready(wiring.forward())
    for k in masks:
        assert bool(jnp.all(masks[k] == masks2[k]))

    # in-kernel connection counts must agree with a direct reduction
    direct_total = float(sum(jnp.sum(m) for m in masks.values()))
    assert abs(float(wiring.total_connections) - direct_total) < 1e-3
    assert 0.0 <= float(wiring.sparsity) <= 1.0

    # emotion-pathway invariants from the reference module
    v = hidden_size // 3
    h2o = masks['hidden_to_output']
    assert bool(jnp.all(h2o[:v, 0] == 1.0))        # valence region -> valence out
    assert bool(jnp.all(h2o[v:2 * v, 1] == 1.0))   # arousal region -> arousal out

    print("KERNEL_OK")
</pallas_src>

<mosaic_0001>
module attributes {stable_mosaic.version = 11 : i64} {
  func.func @_wiring_kernel(%arg0: i32, %arg1: memref<16x32xf32, #tpu.memory_space<vmem>>, %arg2: memref<16x32xf32, #tpu.memory_space<vmem>>, %arg3: memref<32x32xf32, #tpu.memory_space<vmem>>, %arg4: memref<32x32xf32, #tpu.memory_space<vmem>>, %arg5: memref<32x8xf32, #tpu.memory_space<vmem>>, %arg6: memref<32x1xf32, #tpu.memory_space<vmem>>, %arg7: memref<32x1xf32, #tpu.memory_space<vmem>>, %arg8: memref<16x32xf32, #tpu.memory_space<vmem>>, %arg9: memref<32x32xf32, #tpu.memory_space<vmem>>, %arg10: memref<32x8xf32, #tpu.memory_space<vmem>>, %arg11: memref<1x1x1xi32, #tpu.memory_space<vmem>>, %arg12: memref<1x1x1xi32, #tpu.memory_space<vmem>>, %arg13: memref<1x1x1xi32, #tpu.memory_space<vmem>>) attributes {dimension_semantics = [#tpu.dimension_semantics<parallel>], iteration_bounds = array<i64: 1>, scalar_prefetch = 0 : i64, scratch_operands = 0 : i64, tpu.core_type = #tpu.core_type<tc>, window_params = [{transform_indices = @transform_0, window_bounds = array<i64: 16, 32>}, {transform_indices = @transform_1, window_bounds = array<i64: 16, 32>}, {transform_indices = @transform_2, window_bounds = array<i64: 32, 32>}, {transform_indices = @transform_3, window_bounds = array<i64: 32, 32>}, {transform_indices = @transform_4, window_bounds = array<i64: 32, 8>}, {transform_indices = @transform_5, window_bounds = array<i64: 32, 1>}, {transform_indices = @transform_6, window_bounds = array<i64: 32, 1>}, {transform_indices = @transform_7, window_bounds = array<i64: 16, 32>}, {transform_indices = @transform_8, window_bounds = array<i64: 32, 32>}, {transform_indices = @transform_9, window_bounds = array<i64: 32, 8>}, {transform_indices = @transform_10, window_bounds = array<i64: 1, 1, 1>}, {transform_indices = @transform_11, window_bounds = array<i64: 1, 1, 1>}, {transform_indices = @transform_12, window_bounds = array<i64: 1, 1, 1>}]} {
    %c32_i32 = arith.constant 32 : i32
    %0 = arith.muli %arg0, %c32_i32 : i32
    %1 = tpu.iota {dimensions = array<i32: 1>} : vector<1x32xi32>
    %2 = vector.broadcast %0 : i32 to vector<1x32xi32>
    %3 = arith.addi %2, %1 : vector<1x32xi32>
    %c0 = arith.constant 0 : index
    %c0_0 = arith.constant 0 : index
    %4 = vector.load %arg1[%c0, %c0_0] : memref<16x32xf32, #tpu.memory_space<vmem>>, vector<16x32xf32>
    %cst = arith.constant 3.000000e-01 : f32
    %5 = vector.broadcast %cst : f32 to vector<16x32xf32>
    %6 = arith.cmpf ogt, %4, %5 : vector<16x32xf32>
    %7 = arith.extui %6 : vector<16x32xi1> to vector<16x32xi32>
    %8 = arith.sitofp %7 : vector<16x32xi32> to vector<16x32xf32>
    %9 = tpu.iota {dimensions = array<i32: 0>} : vector<16x1xi32>
    %c3_i32 = arith.constant 3 : i32
    %10 = vector.broadcast %c3_i32 : i32 to vector<16x1xi32>
    %11 = arith.cmpi slt, %9, %10 : vector<16x1xi32>
    %c20_i32 = arith.constant 20 : i32
    %12 = vector.broadcast %c20_i32 : i32 to vector<1x32xi32>
    %13 = arith.cmpi slt, %3, %12 : vector<1x32xi32>
    %14 = vector.broadcast %11 : vector<16x1xi1> to vector<16x32xi1>
    %15 = vector.broadcast %13 : vector<1x32xi1> to vector<16x32xi1>
    %16 = arith.andi %14, %15 : vector<16x32xi1>
    %c0_1 = arith.constant 0 : index
    %c0_2 = arith.constant 0 : index
    %17 = vector.load %arg2[%c0_1, %c0_2] : memref<16x32xf32, #tpu.memory_space<vmem>>, vector<16x32xf32>
    %cst_3 = arith.constant 6.000000e-01 : f32
    %18 = vector.broadcast %cst_3 : f32 to vector<16x32xf32>
    %19 = arith.cmpf olt, %17, %18 : vector<16x32xf32>
    %20 = arith.andi %16, %19 : vector<16x32xi1>
    %cst_4 = arith.constant 1.000000e+00 : f32
    %21 = vector.broadcast %cst_4 : f32 to vector<16x32xf32>
    %22 = arith.select %20, %21, %8 : vector<16x32xi1>, vector<16x32xf32>
    %c0_5 = arith.constant 0 : index
    %c0_6 = arith.constant 0 : index
    %23 = vector.load %arg8[%c0_5, %c0_6] : memref<16x32xf32, #tpu.memory_space<vmem>>, vector<16x32xf32>
    tpu.vector_store %arg8[%c0_5, %c0_6], %22 {strides = array<i32>} : memref<16x32xf32, #tpu.memory_space<vmem>>, vector<16x32xf32>,
    %c32_i32_7 = arith.constant 32 : i32
    %24 = vector.broadcast %c32_i32_7 : i32 to vector<1x32xi32>
    %25 = arith.cmpi slt, %3, %24 : vector<1x32xi32>
    %cst_8 = arith.constant 2.000000e+00 : f32
    %26 = vector.broadcast %cst_8 : f32 to vector<16x32xf32>
    %27 = arith.mulf %26, %22 : vector<16x32xf32>
    %cst_9 = arith.constant 0.000000e+00 : f32
    %28 = vector.shape_cast %25 : vector<1x32xi1> to vector<1x32xi1>
    %29 = vector.broadcast %28 : vector<1x32xi1> to vector<16x32xi1>
    %30 = vector.broadcast %cst_9 : f32 to vector<16x32xf32>
    %31 = arith.select %29, %27, %30 : vector<16x32xi1>, vector<16x32xf32>
    %32 = vector.shape_cast %31 : vector<16x32xf32> to vector<1x16x32xf32>
    %cst_10 = arith.constant dense<0.000000e+00> : vector<1xf32>
    %33 = vector.multi_reduction <add>, %32, %cst_10 [1, 2] : vector<1x16x32xf32> to vector<1xf32>
    %34 = vector.shape_cast %33 : vector<1xf32> to vector<1x1x1xf32>
    %35 = vector.extract %34[0, 0, 0] : f32 from vector<1x1x1xf32>
    %36 = arith.fptosi %35 : f32 to i32
    %37 = vector.broadcast %36 : i32 to vector<1x1x1xi32>
    %c0_11 = arith.constant 0 : index
    %c0_12 = arith.constant 0 : index
    %c0_13 = arith.constant 0 : index
    %38 = vector.load %arg11[%c0_11, %c0_12, %c0_13] : memref<1x1x1xi32, #tpu.memory_space<vmem>>, vector<1x1x1xi32>
    tpu.vector_store %arg11[%c0_11, %c0_12, %c0_13], %37 {strides = array<i32>} : memref<1x1x1xi32, #tpu.memory_space<vmem>>, vector<1x1x1xi32>,
    %c32_i32_14 = arith.constant 32 : i32
    %39 = arith.muli %arg0, %c32_i32_14 : i32
    %40 = tpu.iota {dimensions = array<i32: 0>} : vector<32x1xi32>
    %41 = vector.broadcast %39 : i32 to vector<32x1xi32>
    %42 = arith.addi %41, %40 : vector<32x1xi32>
    %43 = tpu.iota {dimensions = array<i32: 1>} : vector<1x32xi32>
    %c0_15 = arith.constant 0 : index
    %c0_16 = arith.constant 0 : index
    %44 = vector.load %arg3[%c0_15, %c0_16] : memref<32x32xf32, #tpu.memory_space<vmem>>, vector<32x32xf32>
    %cst_17 = arith.constant 5.000000e-01 : f32
    %45 = vector.broadcast %cst_17 : f32 to vector<32x32xf32>
    %46 = arith.cmpf ogt, %44, %45 : vector<32x32xf32>
    %47 = arith.extui %46 : vector<32x32xi1> to vector<32x32xi32>
    %48 = arith.sitofp %47 : vector<32x32xi32> to vector<32x32xf32>
    %c0_18 = arith.constant 0 : index
    %c0_19 = arith.constant 0 : index
    %49 = vector.load %arg4[%c0_18, %c0_19] : memref<32x32xf32, #tpu.memory_space<vmem>>, vector<32x32xf32>
    %c10_i32 = arith.constant 10 : i32
    %50 = vector.broadcast %c10_i32 : i32 to vector<32x1xi32>
    %51 = arith.cmpi slt, %42, %50 : vector<32x1xi32>
    %c10_i32_20 = arith.constant 10 : i32
    %52 = vector.broadcast %c10_i32_20 : i32 to vector<32x1xi32>
    %53 = arith.cmpi sge, %42, %52 : vector<32x1xi32>
    %c20_i32_21 = arith.constant 20 : i32
    %54 = vector.broadcast %c20_i32_21 : i32 to vector<32x1xi32>
    %55 = arith.cmpi slt, %42, %54 : vector<32x1xi32>
    %56 = arith.andi %53, %55 : vector<32x1xi1>
    %c20_i32_22 = arith.constant 20 : i32
    %57 = vector.broadcast %c20_i32_22 : i32 to vector<32x1xi32>
    %58 = arith.cmpi sge, %42, %57 : vector<32x1xi32>
    %c10_i32_23 = arith.constant 10 : i32
    %59 = vector.broadcast %c10_i32_23 : i32 to vector<1x32xi32>
    %60 = arith.cmpi slt, %43, %59 : vector<1x32xi32>
    %c10_i32_24 = arith.constant 10 : i32
    %61 = vector.broadcast %c10_i32_24 : i32 to vector<1x32xi32>
    %62 = arith.cmpi sge, %43, %61 : vector<1x32xi32>
    %c20_i32_25 = arith.constant 20 : i32
    %63 = vector.broadcast %c20_i32_25 : i32 to vector<1x32xi32>
    %64 = arith.cmpi slt, %43, %63 : vector<1x32xi32>
    %65 = arith.andi %62, %64 : vector<1x32xi1>
    %c20_i32_26 = arith.constant 20 : i32
    %66 = vector.broadcast %c20_i32_26 : i32 to vector<1x32xi32>
    %67 = arith.cmpi sge, %43, %66 : vector<1x32xi32>
    %68 = vector.broadcast %42 : vector<32x1xi32> to vector<32x32xi32>
    %69 = vector.broadcast %43 : vector<1x32xi32> to vector<32x32xi32>
    %70 = arith.cmpi ne, %68, %69 : vector<32x32xi32>
    %71 = vector.broadcast %51 : vector<32x1xi1> to vector<32x32xi1>
    %72 = vector.broadcast %60 : vector<1x32xi1> to vector<32x32xi1>
    %73 = arith.andi %71, %72 : vector<32x32xi1>
    %74 = vector.broadcast %56 : vector<32x1xi1> to vector<32x32xi1>
    %75 = vector.broadcast %65 : vector<1x32xi1> to vector<32x32xi1>
    %76 = arith.andi %74, %75 : vector<32x32xi1>
    %77 = arith.ori %73, %76 : vector<32x32xi1>
    %78 = arith.andi %77, %70 : vector<32x32xi1>
    %cst_27 = arith.constant 4.000000e-01 : f32
    %cst_28 = arith.constant 0.000000e+00 : f32
    %79 = vector.broadcast %cst_27 : f32 to vector<32x32xf32>
    %80 = vector.broadcast %cst_28 : f32 to vector<32x32xf32>
    %81 = arith.select %78, %79, %80 : vector<32x32xi1>, vector<32x32xf32>
    %82 = vector.broadcast %51 : vector<32x1xi1> to vector<32x32xi1>
    %83 = vector.broadcast %65 : vector<1x32xi1> to vector<32x32xi1>
    %84 = arith.andi %82, %83 : vector<32x32xi1>
    %85 = vector.broadcast %56 : vector<32x1xi1> to vector<32x32xi1>
    %86 = vector.broadcast %60 : vector<1x32xi1> to vector<32x32xi1>
    %87 = arith.andi %85, %86 : vector<32x32xi1>
    %88 = arith.ori %84, %87 : vector<32x32xi1>
    %cst_29 = arith.constant 2.000000e-01 : f32
    %89 = vector.broadcast %cst_29 : f32 to vector<32x32xf32>
    %90 = arith.select %88, %89, %81 : vector<32x32xi1>, vector<32x32xf32>
    %91 = arith.ori %60, %65 : vector<1x32xi1>
    %92 = vector.broadcast %58 : vector<32x1xi1> to vector<32x32xi1>
    %93 = vector.broadcast %91 : vector<1x32xi1> to vector<32x32xi1>
    %94 = arith.andi %92, %93 : vector<32x32xi1>
    %95 = arith.ori %51, %56 : vector<32x1xi1>
    %96 = vector.broadcast %95 : vector<32x1xi1> to vector<32x32xi1>
    %97 = vector.broadcast %67 : vector<1x32xi1> to vector<32x32xi1>
    %98 = arith.andi %96, %97 : vector<32x32xi1>
    %99 = arith.ori %94, %98 : vector<32x32xi1>
    %cst_30 = arith.constant 3.000000e-01 : f32
    %100 = vector.broadcast %cst_30 : f32 to vector<32x32xf32>
    %101 = arith.select %99, %100, %90 : vector<32x32xi1>, vector<32x32xf32>
    %102 = arith.cmpf olt, %49, %101 : vector<32x32xf32>
    %cst_31 = arith.constant 1.000000e+00 : f32
    %103 = vector.broadcast %cst_31 : f32 to vector<32x32xf32>
    %104 = arith.select %102, %103, %48 : vector<32x32xi1>, vector<32x32xf32>
    %c0_32 = arith.constant 0 : index
    %c0_33 = arith.constant 0 : index
    %105 = vector.load %arg9[%c0_32, %c0_33] : memref<32x32xf32, #tpu.memory_space<vmem>>, vector<32x32xf32>
    tpu.vector_store %arg9[%c0_32, %c0_33], %104 {strides = array<i32>} : memref<32x32xf32, #tpu.memory_space<vmem>>, vector<32x32xf32>,
    %c32_i32_34 = arith.constant 32 : i32
    %106 = vector.broadcast %c32_i32_34 : i32 to vector<32x1xi32>
    %107 = arith.cmpi slt, %42, %106 : vector<32x1xi32>
    %cst_35 = arith.constant 2.000000e+00 : f32
    %108 = vector.broadcast %cst_35 : f32 to vector<32x32xf32>
    %109 = arith.mulf %108, %104 : vector<32x32xf32>
    %cst_36 = arith.constant 0.000000e+00 : f32
    %110 = vector.shape_cast %107 : vector<32x1xi1> to vector<32x1xi1>
    %111 = vector.broadcast %110 : vector<32x1xi1> to vector<32x32xi1>
    %112 = vector.broadcast %cst_36 : f32 to vector<32x32xf32>
    %113 = arith.select %111, %109, %112 : vector<32x32xi1>, vector<32x32xf32>
    %114 = vector.shape_cast %113 : vector<32x32xf32> to vector<1x32x32xf32>
    %cst_37 = arith.constant dense<0.000000e+00> : vector<1xf32>
    %115 = vector.multi_reduction <add>, %114, %cst_37 [1, 2] : vector<1x32x32xf32> to vector<1xf32>
    %116 = vector.shape_cast %115 : vector<1xf32> to vector<1x1x1xf32>
    %117 = vector.extract %116[0, 0, 0] : f32 from vector<1x1x1xf32>
    %118 = arith.fptosi %117 : f32 to i32
    %119 = vector.broadcast %118 : i32 to vector<1x1x1xi32>
    %c0_38 = arith.constant 0 : index
    %c0_39 = arith.constant 0 : index
    %c0_40 = arith.constant 0 : index
    %120 = vector.load %arg12[%c0_38, %c0_39, %c0_40] : memref<1x1x1xi32, #tpu.memory_space<vmem>>, vector<1x1x1xi32>
    tpu.vector_store %arg12[%c0_38, %c0_39, %c0_40], %119 {strides = array<i32>} : memref<1x1x1xi32, #tpu.memory_space<vmem>>, vector<1x1x1xi32>,
    %c0_41 = arith.constant 0 : index
    %c0_42 = arith.constant 0 : index
    %121 = vector.load %arg5[%c0_41, %c0_42] : memref<32x8xf32, #tpu.memory_space<vmem>>, vector<32x8xf32>
    %cst_43 = arith.constant 6.000000e-01 : f32
    %122 = vector.broadcast %cst_43 : f32 to vector<32x8xf32>
    %123 = arith.cmpf ogt, %121, %122 : vector<32x8xf32>
    %124 = arith.extui %123 : vector<32x8xi1> to vector<32x8xi32>
    %125 = arith.sitofp %124 : vector<32x8xi32> to vector<32x8xf32>
    %126 = tpu.iota {dimensions = array<i32: 1>} : vector<1x8xi32>
    %c0_44 = arith.constant 0 : index
    %c0_45 = arith.constant 0 : index
    %127 = vector.load %arg6[%c0_44, %c0_45] : memref<32x1xf32, #tpu.memory_space<vmem>>, vector<32x1xf32>
    %c0_46 = arith.constant 0 : index
    %c0_47 = arith.constant 0 : index
    %128 = vector.load %arg7[%c0_46, %c0_47] : memref<32x1xf32, #tpu.memory_space<vmem>>, vector<32x1xf32>
    %c10_i32_48 = arith.constant 10 : i32
    %129 = vector.broadcast %c10_i32_48 : i32 to vector<32x1xi32>
    %130 = arith.cmpi slt, %42, %129 : vector<32x1xi32>
    %c10_i32_49 = arith.constant 10 : i32
    %131 = vector.broadcast %c10_i32_49 : i32 to vector<32x1xi32>
    %132 = arith.cmpi sge, %42, %131 : vector<32x1xi32>
    %c20_i32_50 = arith.constant 20 : i32
    %133 = vector.broadcast %c20_i32_50 : i32 to vector<32x1xi32>
    %134 = arith.cmpi slt, %42, %133 : vector<32x1xi32>
    %135 = arith.andi %132, %134 : vector<32x1xi1>
    %c20_i32_51 = arith.constant 20 : i32
    %136 = vector.broadcast %c20_i32_51 : i32 to vector<32x1xi32>
    %137 = arith.cmpi sge, %42, %136 : vector<32x1xi32>
    %c0_i32 = arith.constant 0 : i32
    %138 = vector.broadcast %c0_i32 : i32 to vector<1x8xi32>
    %139 = arith.cmpi eq, %126, %138 : vector<1x8xi32>
    %c1_i32 = arith.constant 1 : i32
    %140 = vector.broadcast %c1_i32 : i32 to vector<1x8xi32>
    %141 = arith.cmpi eq, %126, %140 : vector<1x8xi32>
    %142 = vector.broadcast %130 : vector<32x1xi1> to vector<32x8xi1>
    %143 = vector.broadcast %139 : vector<1x8xi1> to vector<32x8xi1>
    %144 = arith.andi %142, %143 : vector<32x8xi1>
    %cst_52 = arith.constant 1.000000e+00 : f32
    %145 = vector.broadcast %cst_52 : f32 to vector<32x8xf32>
    %146 = arith.select %144, %145, %125 : vector<32x8xi1>, vector<32x8xf32>
    %147 = vector.broadcast %130 : vector<32x1xi1> to vector<32x8xi1>
    %148 = vector.broadcast %141 : vector<1x8xi1> to vector<32x8xi1>
    %149 = arith.andi %147, %148 : vector<32x8xi1>
    %cst_53 = arith.constant 3.000000e-01 : f32
    %150 = vector.broadcast %cst_53 : f32 to vector<32x1xf32>
    %151 = arith.cmpf olt, %127, %150 : vector<32x1xf32>
    %152 = vector.broadcast %151 : vector<32x1xi1> to vector<32x8xi1>
    %153 = arith.andi %149, %152 : vector<32x8xi1>
    %cst_54 = arith.constant 5.000000e-01 : f32
    %154 = vector.broadcast %cst_54 : f32 to vector<32x8xf32>
    %155 = arith.select %153, %154, %146 : vector<32x8xi1>, vector<32x8xf32>
    %156 = vector.broadcast %135 : vector<32x1xi1> to vector<32x8xi1>
    %157 = vector.broadcast %141 : vector<1x8xi1> to vector<32x8xi1>
    %158 = arith.andi %156, %157 : vector<32x8xi1>
    %cst_55 = arith.constant 1.000000e+00 : f32
    %159 = vector.broadcast %cst_55 : f32 to vector<32x8xf32>
    %160 = arith.select %158, %159, %155 : vector<32x8xi1>, vector<32x8xf32>
    %161 = vector.broadcast %135 : vector<32x1xi1> to vector<32x8xi1>
    %162 = vector.broadcast %139 : vector<1x8xi1> to vector<32x8xi1>
    %163 = arith.andi %161, %162 : vector<32x8xi1>
    %cst_56 = arith.constant 3.000000e-01 : f32
    %164 = vector.broadcast %cst_56 : f32 to vector<32x1xf32>
    %165 = arith.cmpf olt, %127, %164 : vector<32x1xf32>
    %166 = vector.broadcast %165 : vector<32x1xi1> to vector<32x8xi1>
    %167 = arith.andi %163, %166 : vector<32x8xi1>
    %cst_57 = arith.constant 5.000000e-01 : f32
    %168 = vector.broadcast %cst_57 : f32 to vector<32x8xf32>
    %169 = arith.select %167, %168, %160 : vector<32x8xi1>, vector<32x8xf32>
    %cst_58 = arith.constant 8.000000e-01 : f32
    %170 = vector.broadcast %cst_58 : f32 to vector<32x1xf32>
    %171 = arith.cmpf olt, %127, %170 : vector<32x1xf32>
    %cst_59 = arith.constant 5.000000e-01 : f32
    %172 = vector.broadcast %cst_59 : f32 to vector<32x1xf32>
    %173 = arith.cmpf olt, %128, %172 : vector<32x1xf32>
    %174 = arith.andi %137, %171 : vector<32x1xi1>
    %175 = arith.ori %139, %141 : vector<1x8xi1>
    %176 = vector.broadcast %174 : vector<32x1xi1> to vector<32x8xi1>
    %177 = vector.broadcast %175 : vector<1x8xi1> to vector<32x8xi1>
    %178 = arith.andi %176, %177 : vector<32x8xi1>
    %cst_60 = arith.constant 1.000000e+00 : f32
    %179 = vector.broadcast %cst_60 : f32 to vector<32x8xf32>
    %180 = arith.select %178, %179, %169 : vector<32x8xi1>, vector<32x8xf32>
    %cst_61 = arith.constant dense<true> : vector<32x1xi1>
    %181 = arith.xori %171, %cst_61 : vector<32x1xi1>
    %182 = arith.andi %137, %181 : vector<32x1xi1>
    %183 = vector.broadcast %139 : vector<1x8xi1> to vector<32x8xi1>
    %184 = vector.broadcast %173 : vector<32x1xi1> to vector<32x8xi1>
    %185 = arith.andi %183, %184 : vector<32x8xi1>
    %cst_62 = arith.constant dense<true> : vector<32x1xi1>
    %186 = arith.xori %173, %cst_62 : vector<32x1xi1>
    %187 = vector.broadcast %141 : vector<1x8xi1> to vector<32x8xi1>
    %188 = vector.broadcast %186 : vector<32x1xi1> to vector<32x8xi1>
    %189 = arith.andi %187, %188 : vector<32x8xi1>
    %190 = arith.ori %185, %189 : vector<32x8xi1>
    %191 = vector.broadcast %182 : vector<32x1xi1> to vector<32x8xi1>
    %192 = arith.andi %191, %190 : vector<32x8xi1>
    %cst_63 = arith.constant 1.000000e+00 : f32
    %193 = vector.broadcast %cst_63 : f32 to vector<32x8xf32>
    %194 = arith.select %192, %193, %180 : vector<32x8xi1>, vector<32x8xf32>
    %c0_64 = arith.constant 0 : index
    %c0_65 = arith.constant 0 : index
    %195 = vector.load %arg10[%c0_64, %c0_65] : memref<32x8xf32, #tpu.memory_space<vmem>>, vector<32x8xf32>
    tpu.vector_store %arg10[%c0_64, %c0_65], %194 {strides = array<i32>} : memref<32x8xf32, #tpu.memory_space<vmem>>, vector<32x8xf32>,
    %cst_66 = arith.constant 2.000000e+00 : f32
    %196 = vector.broadcast %cst_66 : f32 to vector<32x8xf32>
    %197 = arith.mulf %196, %194 : vector<32x8xf32>
    %cst_67 = arith.constant 0.000000e+00 : f32
    %198 = vector.shape_cast %107 : vector<32x1xi1> to vector<32x1xi1>
    %199 = vector.broadcast %198 : vector<32x1xi1> to vector<32x8xi1>
    %200 = vector.broadcast %cst_67 : f32 to vector<32x8xf32>
    %201 = arith.select %199, %197, %200 : vector<32x8xi1>, vector<32x8xf32>
    %202 = vector.shape_cast %201 : vector<32x8xf32> to vector<1x32x8xf32>
    %cst_68 = arith.constant dense<0.000000e+00> : vector<1xf32>
    %203 = vector.multi_reduction <add>, %202, %cst_68 [1, 2] : vector<1x32x8xf32> to vector<1xf32>
    %204 = vector.shape_cast %203 : vector<1xf32> to vector<1x1x1xf32>
    %205 = vector.extract %204[0, 0, 0] : f32 from vector<1x1x1xf32>
    %206 = arith.fptosi %205 : f32 to i32
    %207 = vector.broadcast %206 : i32 to vector<1x1x1xi32>
    %c0_69 = arith.constant 0 : index
    %c0_70 = arith.constant 0 : index
    %c0_71 = arith.constant 0 : index
    %208 = vector.load %arg13[%c0_69, %c0_70, %c0_71] : memref<1x1x1xi32, #tpu.memory_space<vmem>>, vector<1x1x1xi32>
    tpu.vector_store %arg13[%c0_69, %c0_70, %c0_71], %207 {strides = array<i32>} : memref<1x1x1xi32, #tpu.memory_space<vmem>>, vector<1x1x1xi32>,
    return
  }
  func.func @transform_0(%arg0: i32) -> (i32, i32) {
    %c0_i32 = arith.constant 0 : i32
    %c0_i32_0 = arith.constant 0 : i32
    return %c0_i32, %arg0 : i32, i32
  }
  func.func @transform_1(%arg0: i32) -> (i32, i32) {
    %c0_i32 = arith.constant 0 : i32
    %c0_i32_0 = arith.constant 0 : i32
    return %c0_i32, %arg0 : i32, i32
  }
  func.func @transform_2(%arg0: i32) -> (i32, i32) {
    %c0_i32 = arith.constant 0 : i32
    %c0_i32_0 = arith.constant 0 : i32
    return %arg0, %c0_i32 : i32, i32
  }
  func.func @transform_3(%arg0: i32) -> (i32, i32) {
    %c0_i32 = arith.constant 0 : i32
    %c0_i32_0 = arith.constant 0 : i32
    return %arg0, %c0_i32 : i32, i32
  }
  func.func @transform_4(%arg0: i32) -> (i32, i32) {
    %c0_i32 = arith.constant 0 : i32
    %c0_i32_0 = arith.constant 0 : i32
    return %arg0, %c0_i32 : i32, i32
  }
  func.func @transform_5(%arg0: i32) -> (i32, i32) {
    %c0_i32 = arith.constant 0 : i32
    %c0_i32_0 = arith.constant 0 : i32
    return %arg0, %c0_i32 : i32, i32
  }
  func.func @transform_6(%arg0: i32) -> (i32, i32) {
    %c0_i32 = arith.constant 0 : i32
    %c0_i32_0 = arith.constant 0 : i32
    return %arg0, %c0_i32 : i32, i32
  }
  func.func @transform_7(%arg0: i32) -> (i32, i32) {
    %c0_i32 = arith.constant 0 : i32
    %c0_i32_0 = arith.constant 0 : i32
    return %c0_i32, %arg0 : i32, i32
  }
  func.func @transform_8(%arg0: i32) -> (i32, i32) {
    %c0_i32 = arith.constant 0 : i32
    %c0_i32_0 = arith.constant 0 : i32
    return %arg0, %c0_i32 : i32, i32
  }
  func.func @transform_9(%arg0: i32) -> (i32, i32) {
    %c0_i32 = arith.constant 0 : i32
    %c0_i32_0 = arith.constant 0 : i32
    return %arg0, %c0_i32 : i32, i32
  }
  func.func @transform_10(%arg0: i32) -> (i32, i32, i32) {
    %c0_i32 = arith.constant 0 : i32
    %c0_i32_0 = arith.constant 0 : i32
    %c0_i32_1 = arith.constant 0 : i32
    return %arg0, %c0_i32, %c0_i32_0 : i32, i32, i32
  }
  func.func @transform_11(%arg0: i32) -> (i32, i32, i32) {
    %c0_i32 = arith.constant 0 : i32
    %c0_i32_0 = arith.constant 0 : i32
    %c0_i32_1 = arith.constant 0 : i32
    return %arg0, %c0_i32, %c0_i32_0 : i32, i32, i32
  }
  func.func @transform_12(%arg0: i32) -> (i32, i32, i32) {
    %c0_i32 = arith.constant 0 : i32
    %c0_i32_0 = arith.constant 0 : i32
    %c0_i32_1 = arith.constant 0 : i32
    return %arg0, %c0_i32, %c0_i32_0 : i32, i32, i32
  }
}

</mosaic_0001>

<bundles_post_ra>
// kernel: _run.1
= control target key start
LH: loop header
LB: loop body
LE: loop exit
PB: predicated region body
PF: predicated region fallthrough
CT: control target
= control target key end

     0   :  { %18 = vsyncpa [#allocation3], 0  ;;  %s1464_s0 = inlined_call_operand.vmem [shape: f32[16,32], index: 0, kind: input, shape index: {}]   ;;  %s1465_s1 = inlined_call_operand.vmem [shape: f32[16,32], index: 1, kind: input, shape index: {}]   ;;  %s1466_s2 = inlined_call_operand.vmem [shape: f32[32,32], index: 2, kind: input, shape index: {}]   ;;  %s1467_s3 = inlined_call_operand.vmem [shape: f32[32,32], index: 3, kind: input, shape index: {}]   ;;  %s1468_s4 = inlined_call_operand.vmem [shape: f32[32,8], index: 4, kind: input, shape index: {}]   ;;  %s1469_s5 = inlined_call_operand.vmem [shape: f32[32,1], index: 5, kind: input, shape index: {}]   ;;  %s1470_s6 = inlined_call_operand.vmem [shape: f32[32,1], index: 6, kind: input, shape index: {}]   ;;  %s1471_s7 = inlined_call_operand.hbm [shape: f32[16,32], index: 7, kind: output, shape index: {0}]   ;;  %s1472_s8 = inlined_call_operand.hbm [shape: f32[32,32], index: 8, kind: output, shape index: {1}]   ;;  %s1473_s9 = inlined_call_operand.vmem [shape: f32[32,8], index: 9, kind: output, shape index: {2}]   ;;  %s1474_s10 = inlined_call_operand.hbm [shape: s32[1,1,1], index: 10, kind: output, shape index: {3}]   ;;  %s1475_s11 = inlined_call_operand.hbm [shape: s32[1,1,1], index: 11, kind: output, shape index: {4}]   ;;  %s1476_s12 = inlined_call_operand.hbm [shape: s32[1,1,1], index: 12, kind: output, shape index: {5}]  }
   0x1   :  { %19 = vsyncpa [#allocation5], 0  ;;  %v319_v0 = vld [vmem:[%s1470_s6] sm:$0xff]  ;;  %v316_v1 = vld [vmem:[%s1469_s5 + $0x8] sm:$0xff]  ;;  %v805_v3 = vmov 0   ;;  %v36_v5 = vlaneseq  ;;  %vm1481_vm4 = vmmov 1  }
   0x2   :  { %v320_v2 = vld [vmem:[%s1470_s6 + $0x8] sm:$0xff]  ;;  %678 = vset.pattern.permute.xlu1 %v805_v3  ;;  %677 = vset.pattern.permute.xlu0 %v805_v3  ;;  %vm397_vm0 = vcmp.lt.f32.partialorder %v319_v0, 0.5  ;;  %vm342_vm1 = vcmp.lt.f32.partialorder %v316_v1, 0.3  ;;  %v315_v4 = vld [vmem:[%s1469_s5] sm:$0xff]  ;;  %v321_v8 = vld [vmem:[%s1470_s6 + $0x10] sm:$0xff] }
   0x3   :  { %vm398_vm2 = vcmp.lt.f32.partialorder %v320_v2, 0.5  ;;  %v444_v6 = vsel %vm397_vm0, 1, %v805_v3  ;;  %v346_v7 = vsel %vm342_vm1, 1, %v805_v3  ;;  %vm341_vm3 = vcmp.lt.f32.partialorder %v315_v4, 0.3  ;;  %vm900_vm5 = vmxor %vm397_vm0, %vm1481_vm4  ;;  %v317_v14 = vld [vmem:[%s1469_s5 + $0x10] sm:$0xff] }
   0x4   :  { %449 = vperm.xlu1 %678, %v444_v6   ;;  %353 = vperm.xlu0 %677, %v346_v7   ;;  %v445_v10 = vsel %vm398_vm2, 1, %v805_v3  ;;  %v345_v11 = vsel %vm341_vm3, 1, %v805_v3  ;;  %vm1479_vm6 = vcmp.lt.f32.partialorder %v321_v8, 0.5  ;;  %vm469_vm7 = vmxor %vm398_vm2, %vm1481_vm4  ;;  %v907_v12 = vshrl.u32 %v36_v5, 7  ;;  %v917_v15 = vld [vmem:[%s1470_s6 + $0x18] sm:$0xff]  ;;  %v299_v18 = vld [vmem:[%s1468_s4] sm:$0xff] }
   0x5   :  { %v909_v13 = vand.u32 127, %v36_v5  ;;  %vm921_vm8 = vmxor %vm1479_vm6, %vm1481_vm4  ;;  %vm395_vm9 = vcmp.lt.f32.partialorder %v317_v14, 0.8  ;;  %v473_v19 = vsel %vm469_vm7, 1, %v805_v3  ;;  %v472_v20 = vsel %vm900_vm5, 1, %v805_v3  ;;  %v300_v30 = vld [vmem:[%s1468_s4 + $0x8] sm:$0xff] }
   0x6   :  { %v926_v17 = vadd.s32 16, %v907_v12  ;;  %vm939_vm12 = vmxor %vm395_vm9, %vm1481_vm4  ;;  %vm343_vm13 = vcmp.lt.f32.partialorder %v317_v14, 0.3  ;;  %vm1482_vm5 = vcmp.lt.f32.partialorder %v917_v15, 0.5  ;;  %vm303_vm7 = vcmp.gt.f32.partialorder %v299_v18, 0.6 }
   0x7   :  { %vm1477_vm10 = vcmp.lt.s32.totalorder %v909_v13, 20  ;;  %vm143_vm11 = vcmp.ge.s32.totalorder %v909_v13, 10  ;;  %vm1478_vm15 = vcmp.lt.s32.totalorder %v909_v13, 10  ;;  %v807_v24 = vmov 0.0   ;;  %v301_v38 = vld [vmem:[%s1468_s4 + $0x10] sm:$0xff]  ;;  %v318_v40 = vld [vmem:[%s1469_s5 + $0x18] sm:$0xff] }
   0x8   :  { %452 = vperm.xlu1 %678, %v445_v10   ;;  %350 = vperm.xlu0 %677, %v345_v11   ;;  %vm140_vm14 = vcmp.ge.s32.totalorder %v926_v17, 20  ;;  %vm947_vm0 = vmand %vm143_vm11, %vm1477_vm10  ;;  %vm1480_vm1 = vcmp.lt.s32.totalorder %v926_v17, 20  ;;  %vm149_vm2 = vcmp.ne.s32.totalorder %v926_v17, %v909_v13  ;;  %vm1483_vm10 = vcmp.eq.s32.totalorder %v909_v13, 0  ;;  %v104_v52 = vld [vmem:[%s1466_s2 + $0x10] sm:$0xff]  ;;  %v102_v57 = vld [vmem:[%s1466_s2] sm:$0xff] }
   0x9   :  { %vm958_vm3 = vmor %vm1478_vm15, %vm947_vm0  ;;  %v642_v25 = vsel %vm303_vm7, 1.0, %v807_v24  ;;  %v347_v26 = vsel %vm343_vm13, 1, %v805_v3  ;;  %vm1484_vm6 = vcmp.ge.s32.totalorder %v909_v13, 20  ;;  %v1001_v32 = vadd.s32 8, %v907_v12  ;;  %v120_v58 = vld [vmem:[%s1467_s3 + $0x10] sm:$0xff]  ;;  %v105_v60 = vld [vmem:[%s1466_s2 + $0x18] sm:$0xff] }
   0xa   :  { %vm177_vm11 = vmand %vm1480_vm1, %vm947_vm0  ;;  %v980_v28 = vsel %vm1483_vm10, 1.0, %v642_v25  ;;  %vm1506_vm13 = vcmp.lt.s32.totalorder %v926_v17, 20  ;;  %v474_v34 = vsel %vm921_vm8, 1, %v805_v3  ;;  %v1527_v50 = vmov 0  ;;  %v41_v62 = vld [vmem:[%s1464_s0 + $0x8] sm:$0xff]  ;;  %v121_v1 = vld [vmem:[%s1467_s3 + $0x18] sm:$0xff] }
   0xb   :  { %vm973_vm15 = vmand %vm140_vm14, %vm395_vm9  ;;  %v1532_v56 = vmov 0  ;;  %v1539_v0 = vmov 0  ;;  %v247_v2 = vsel %vm958_vm3, 0.3, %v807_v24  ;;  %v103_v10 = vld [vmem:[%s1466_s2 + $0x8] sm:$0xff]  ;;  %v40_v11 = vld [vmem:[%s1464_s0] sm:$0xff] }
   0xc   :  { %480 = vperm.xlu1 %678, %v473_v19   ;;  %477 = vperm.xlu0 %677, %v472_v20   ;;  %vm185_vm1 = vmand %vm177_vm11, %vm149_vm2  ;;  %vm1509_vm11 = vcmp.lt.f32.partialorder %v321_v8, 0.5  ;;  %v408_v44 = vsel %vm973_vm15, 1, %v805_v3  ;;  %v118_v14 = vld [vmem:[%s1467_s3] sm:$0xff]  ;;  %v119_v22 = vld [vmem:[%s1467_s3 + $0x8] sm:$0xff] }
   0xd   :  { %vm985_vm7 = vmxor %vm1482_vm5, %vm1481_vm4  ;;  %v446_v35 = vsel %vm1509_vm11, 1, %v805_v3  ;;  %v189_v36 = vsel %vm185_vm1, 0.4, %v807_v24  ;;  %vm1510_vm4 = vcmp.lt.s32.totalorder %v909_v13, 10  ;;  %vm1485_vm1 = vcmp.ge.s32.totalorder %v1001_v32, 10  ;;  %v62_v19 = vld [vmem:[%s1465_s1] sm:$0xff] }
   0xe   :  { %vm996_vm9 = vmand %vm140_vm14, %vm958_vm3  ;;  %vm305_vm11 = vcmp.gt.f32.partialorder %v301_v38, 0.6  ;;  %v475_v54 = vsel %vm985_vm7, 1, %v805_v3  ;;  %vm1534_vm7 = vcmp.lt.s32.totalorder %v926_v17, 20 }
   0xf   :  { %vm1008_vm2 = vmand %vm1506_vm13, %vm1484_vm6  ;;  %vm1521_vm6 = vcmp.eq.s32.totalorder %v909_v13, 0  ;;  %v1105_v51 = vsel %vm305_vm11, 1.0, %v807_v24 }
  0x10   :  { %356 = vperm.xlu1 %678, %v347_v26   ;;  %680 = vperm.xlu0 %677, %v805_v3   ;;  %vm1511_vm5 = vmmov %vm1506_vm13  ;;  %vm304_vm13 = vcmp.gt.f32.partialorder %v300_v30, 0.6 }
  0x11   :  { %vm1022_vm10 = vmand %vm1511_vm5, %vm1510_vm4  ;;  %vm1486_vm4 = vcmp.lt.s32.totalorder %v1001_v32, 10  ;;  %vm1516_vm5 = vcmp.lt.s32.totalorder %v909_v13, 10  ;;  %v1057_v43 = vsel %vm304_vm13, 1.0, %v807_v24 }
  0x12   :  { %vm1037_vm8 = vmand %vm140_vm14, %vm939_vm12  ;;  %v205_v41 = vsel %vm1022_vm10, 0.2, %v189_v36  ;;  %vm1487_vm14 = vcmp.eq.s32.totalorder %v909_v13, 1 }
  0x13   :  { %vm1052_vm12 = vmand %vm1486_vm4, %vm1516_vm5  ;;  %v502_v7 = vsel %vm1037_vm8, 1, %v805_v3  ;;  %vm1547_vm8 = vcmp.lt.s32.totalorder %v909_v13, 10 }
  0x14   :  { %483 = vperm.xlu1 %678, %v474_v34   ;;  %455 = vperm.xlu0 %677, %v446_v35   ;;  %vm1067_vm10 = vmand %vm1485_vm1, %vm947_vm0 }
  0x15   :  { %vm1075_vm13 = vmand %vm1486_vm4, %vm1521_vm6 }
  0x16   :  { %vm1524_vm15 = vmor %vm996_vm9, %vm1008_vm2  ;;  %v332_v48 = vsel %vm1075_vm13, 1.0, %v1057_v43  ;;  %vm1529_vm9 = vcmp.lt.f32.partialorder %v917_v15, 0.5  ;;  %vm1530_vm2 = vcmp.lt.f32.partialorder %v318_v40, 0.8 }
  0x17   :  { %v246_v47 = vsel %vm1524_vm15, 0.3, %v205_v41  ;;  %vm1091_vm5 = vmand %vm1486_vm4, %vm1487_vm14  ;;  %v447_v53 = vsel %vm1529_vm9, 1, %v805_v3  ;;  %v409_v55 = vsel %vm1530_vm2, 1, %v805_v3  ;;  %vm1531_vm15 = vcmp.eq.s32.totalorder %v909_v13, 0 }
  0x18   :  { %685 = vperm.xlu0 %677, %v805_v3   ;;  %417 = vperm.xlu1 %678, %v408_v44   ;;  %vm1100_vm6 = vmand %vm1485_vm1, %vm1487_vm14  ;;  %vm108_vm9 = vcmp.gt.f32.partialorder %v104_v52, 0.5  ;;  %vm250_vm4 = vcmp.lt.f32.partialorder %v120_v58, %v246_v47 }
  0x19   :  { %v1528_v50 = vsel %vm1100_vm6, 4294967295, %v1527_v50  ;;  %vm1122_vm11 = vmand %vm1485_vm1, %vm1531_vm15  ;;  %v640_v61 = vsel %vm108_vm9, 1.0, %v807_v24  ;;  %vm1541_vm1 = vmmov 1  }
  0x1a   :  { %v1533_v56 = vsel %vm1122_vm11, 4294967295, %v1532_v56  ;;  %vm1136_vm2 = vmand %vm1534_vm7, %vm1487_vm14  ;;  %vm1538_vm14 = vcmp.lt.s32.totalorder %v926_v17, 20  ;;  %vm109_vm11 = vcmp.gt.f32.partialorder %v105_v60, 0.5  ;;  %v254_v6 = vsel %vm250_vm4, 1.0, %v640_v61 }
  0x1b   :  { %v379_v63 = vsel %vm1136_vm2, 1.0, %v1105_v51  ;;  %vm1537_vm7 = vmmov %vm1531_vm15  ;;  %vm1542_vm2 = vcmp.lt.f32.partialorder %v318_v40, 0.8  ;;  %v641_v5 = vsel %vm109_vm11, 1.0, %v807_v24  ;;  %vm106_vm15 = vcmp.gt.f32.partialorder %v102_v57, 0.5 }
  0x1c   :  { %vm1158_vm9 = vmand %vm1538_vm14, %vm1537_vm7  ;;  %458 = vperm.xlu0 %677, %v447_v53   ;;  %486 = vperm.xlu1 %678, %v475_v54   ;;  %vm251_vm14 = vcmp.lt.f32.partialorder %v121_v1, %v247_v2  ;;  %vm43_vm7 = vcmp.gt.f32.partialorder %v41_v62, 0.3  ;;  %vm1546_vm4 = vcmp.ne.s32.totalorder %v907_v12, %v909_v13  ;;  %v638_v16 = vsel %vm106_vm15, 1.0, %v807_v24 }
  0x1d   :  { %v1540_v0 = vsel %vm1158_vm9, 4294967295, %v1539_v0  ;;  %vm1170_vm6 = vmxor %vm1542_vm2, %vm1541_vm1  ;;  %v255_v8 = vsel %vm251_vm14, 1.0, %v641_v5  ;;  %vm1545_vm1 = vcmask 261120   ;;  %v637_v9 = vsel %vm43_vm7, 1.0, %v807_v24 }
  0x1e   :  { %vm180_vm3 = vmor %vm1052_vm12, %vm1067_vm10  ;;  %258 = vst.msk [vmem:[#allocation4 + $0x10] sm:$0xff] %vm1545_vm1, %v254_v6  ;;  %vm1550_vm10 = vcmp.ne.s32.totalorder %v1001_v32, %v909_v13  ;;  %vm1551_vm7 = vcmp.lt.s32.totalorder %v1001_v32, 10  ;;  %v503_v20 = vsel %vm1170_vm6, 1, %v805_v3 }
  0x1f   :  { %vm183_vm11 = vmand %vm1547_vm8, %vm1546_vm4  ;;  %vm1553_vm4 = vcmp.ge.s32.totalorder %v1001_v32, 10 }
  0x20   :  { %vm1548_vm2 = vmmov %vm1545_vm1  ;;  %v187_v15 = vsel %vm183_vm11, 0.4, %v807_v24  ;;  %511 = vperm.xlu0 %677, %v502_v7   ;;  %420 = vperm.xlu1 %678, %v409_v55   ;;  %vm1554_vm11 = vcmp.ge.s32.totalorder %v909_v13, 20 }
  0x21   :  { %259 = vst.msk [vmem:[#allocation4 + $0x18] sm:$0xff] %vm1548_vm2, %v255_v8  ;;  %vm1549_vm12 = vmmov %vm1545_vm1  ;;  %v203_v18 = vsel %vm947_vm0, 0.2, %v187_v15  ;;  %vm42_vm2 = vcmp.gt.f32.partialorder %v40_v11, 0.3 }
  0x22   :  { %72 = vst.msk [vmem:[#allocation2 + $0x8] sm:$0xff] %vm1549_vm12, %v637_v9  ;;  %vm184_vm14 = vmand %vm180_vm3, %vm1550_vm10  ;;  %vm107_vm3 = vcmp.gt.f32.partialorder %v103_v10, 0.5  ;;  %v244_v21 = vsel %vm1554_vm11, 0.3, %v203_v18  ;;  %vm51_vm10 = vcmp.lt.s32.totalorder %v907_v12, 3  ;;  %v636_v12 = vsel %vm42_vm2, 1.0, %v807_v24 }
  0x23   :  { %v188_v17 = vsel %vm184_vm14, 0.4, %v807_v24  ;;  %vm192_vm1 = vmand %vm1551_vm7, %vm947_vm0  ;;  %vm248_vm0 = vcmp.lt.f32.partialorder %v118_v14, %v244_v21  ;;  %v639_v25 = vsel %vm107_vm3, 1.0, %v807_v24 }
  0x24   :  { %vm1552_vm15 = vmmov %vm1547_vm8  ;;  %v252_v3 = vsel %vm248_vm0, 1.0, %v638_v16  ;;  %514 = vperm.xlu0 %677, %v503_v20  }
  0x25   :  { %vm196_vm8 = vmand %vm1553_vm4, %vm1552_vm15  ;;  %vm64_vm15 = vcmp.lt.f32.partialorder %v62_v19, 0.6 }
  0x26   :  { %vm200_vm12 = vmor %vm192_vm1, %vm196_vm8  ;;  %vm1558_vm8 = vcmask 261120  }
  0x27   :  { %v204_v23 = vsel %vm200_vm12, 0.2, %v188_v17  ;;  %vm1555_vm6 = vmmov %vm1553_vm4  ;;  %256 = vst.msk [vmem:[#allocation4] sm:$0xff] %vm1558_vm8, %v252_v3 }
  0x28   :  { %vm1556_vm14 = vmmov %vm1551_vm7 }
  0x29   :  { %vm223_vm7 = vmor %vm1556_vm14, %vm1555_vm6 }
  0x2a   :  { %vm1557_vm1 = vmmov %vm1554_vm11  ;;  %vm1559_vm11 = vcmp.lt.s32.totalorder %v909_v13, 20 }
  0x2b   :  { %vm237_vm4 = vmand %vm223_vm7, %vm1557_vm1 }
  0x2c   :  { %v245_v26 = vsel %vm237_vm4, 0.3, %v204_v23  ;;  %vm60_vm12 = vmand %vm51_vm10, %vm1559_vm11 }
  0x2d   :  { %vm249_vm9 = vcmp.lt.f32.partialorder %v119_v22, %v245_v26  ;;  %vm66_vm13 = vmand %vm60_vm12, %vm64_vm15 }
  0x2e   :  { %v253_v27 = vsel %vm249_vm9, 1.0, %v639_v25  ;;  %v68_v29 = vsel %vm66_vm13, 1.0, %v636_v12 }
  0x2f   :  { %20 = vsyncpa [#allocation8], 0  ;;  %v264_v30 = vmul.f32 2.0, %v252_v3  ;;  %v265_v31 = vmul.f32 2.0, %v253_v27  ;;  %v266_v32 = vmul.f32 2.0, %v254_v6  ;;  %v74_v35 = vmul.f32 2.0, %v68_v29 }
  0x30   :  { %vm1560_vm0 = vmmov %vm1558_vm8  ;;  %v75_v36 = vmul.f32 2.0, %v637_v9  ;;  %vm73_vm2 = vcmp.lt.s32.totalorder %v909_v13, 32  ;;  %v267_v38 = vmul.f32 2.0, %v255_v8  ;;  %vm1569_vm8 = vnez %v1528_v50  ;;  %v302_v19 = vld [vmem:[%s1468_s4 + $0x18] sm:$0xff] }
  0x31   :  { %257 = vst.msk [vmem:[#allocation4 + $0x8] sm:$0xff] %vm1560_vm0, %v253_v27  ;;  %vm1561_vm6 = vmmov %vm1560_vm0  ;;  %v78_v40 = vsel %vm73_vm2, %v74_v35, 0.0  ;;  %vm1570_vm11 = vnez %v1533_v56 }
  0x32   :  { %71 = vst.msk [vmem:[#allocation2] sm:$0xff] %vm1561_vm6, %v68_v29  ;;  %vm1562_vm3 = vmmov %vm1560_vm0  ;;  %v79_v41 = vsel %vm73_vm2, %v75_v36, 0.0  ;;  %vm1571_vm6 = vcmp.eq.s32.totalorder %v909_v13, 1 }
  0x33   :  { %v280_v33 = vsel %vm1562_vm3, %v264_v30, 0.0  ;;  %vm1563_vm14 = vmmov %vm1560_vm0 }
  0x34   :  { %v281_v34 = vsel %vm1563_vm14, %v265_v31, 0.0  ;;  %vm1564_vm9 = vmmov %vm1560_vm0 }
  0x35   :  { %v282_v37 = vadd.f32 %v281_v34, %v280_v33  ;;  %v283_v39 = vsel %vm1564_vm9, %v266_v32, 0.0  ;;  %vm1565_vm13 = vmmov %vm1560_vm0  ;;  %vm1575_vm9 = vcmp.eq.s32.totalorder %v909_v13, 0 }
  0x36   :  { %v285_v44 = vsel %vm1565_vm13, %v267_v38, 0.0  ;;  %vm1566_vm10 = vmmov %vm1560_vm0 }
  0x37   :  { %v284_v42 = vadd.f32 %v283_v39, %v282_v37  ;;  %v80_v45 = vsel %vm1566_vm10, %v78_v40, 0.0  ;;  %vm1567_vm7 = vmmov %vm1560_vm0 }
  0x38   :  { %v81_v47 = vsel %vm1567_vm7, %v79_v41, 0.0  ;;  %vm1574_vm2 = vmmov %vm1571_vm6 }
  0x39   :  { %v286_v52 = vadd.f32 %v285_v44, %v284_v42  ;;  %v82_v53 = vadd.f32 %v81_v47, %v80_v45  ;;  %vm1271_vm13 = vmor %vm1575_vm9, %vm1574_vm2 }
  0x3a   :  { %vm1578_vm10 = vmmov %vm1575_vm9 }
  0x43   :  { %287 = vadd.xlane.f32.xlu0 %v286_v52 }
  0x44   :  { %83 = vadd.xlane.f32.xlu1 %v82_v53 }
  0x83   :  { %v450_v54 = vpop.permute.xlu1 %449  ;;  %v354_v55 = vpop.permute.xlu0 %353 }
  0x84   :  { %vm362_vm15 = vcmp.eq.s32.totalorder %v354_v55, 1 }
  0x85   :  { %vm366_vm1 = vmand %vm1091_vm5, %vm362_vm15  ;;  %vm460_vm5 = vcmp.eq.s32.totalorder %v450_v54, 1 }
  0x86   :  { %v370_v57 = vsel %vm366_vm1, 0.5, %v332_v48  ;;  %vm386_vm12 = vmand %vm1570_vm11, %vm362_vm15  ;;  %vm1584_vm11 = vnez %v1540_v0 }
  0x87   :  { %v453_v58 = vpop.permute.xlu1 %452  ;;  %v351_v60 = vpop.permute.xlu0 %350  ;;  %v378_v61 = vsel %vm1569_vm8, 1.0, %v370_v57  ;;  %vm1277_vm7 = vmand %vm1578_vm10, %vm460_vm5 }
  0x88   :  { %vm361_vm0 = vcmp.eq.s32.totalorder %v351_v60, 1  ;;  %v390_v62 = vsel %vm386_vm12, 0.5, %v378_v61  ;;  %vm1581_vm1 = vmmov %vm1574_vm2 }
  0x89   :  { %vm1260_vm3 = vmand %vm1571_vm6, %vm361_vm0  ;;  %vm461_vm0 = vcmp.eq.s32.totalorder %v453_v58, 1 }
  0x8a   :  { %v369_v43 = vsel %vm1260_vm3, 0.5, %v980_v28  ;;  %vm1585_vm6 = vmmov %vm1581_vm1 }
  0x8b   :  { %v481_v46 = vpop.permute.xlu1 %480  ;;  %v478_v48 = vpop.permute.xlu0 %477 }
  0x8c   :  { %vm489_vm14 = vcmp.eq.s32.totalorder %v481_v46, 1  ;;  %vm488_vm15 = vcmp.eq.s32.totalorder %v478_v48, 1 }
  0x8d   :  { %vm1283_vm4 = vmand %vm1581_vm1, %vm489_vm14 }
  0x8e   :  { %vm1291_vm3 = vmand %vm1585_vm6, %vm488_vm15  ;;  %vm1589_vm15 = vcmp.eq.s32.totalorder %v909_v13, 0 }
  0x8f   :  { %v357_v28 = vpop.permute.xlu1 %356  ;;  %v681_v1 = vpop.permute.xlu0 %680  ;;  %vm1305_vm1 = vmand %vm1589_vm15, %vm461_vm0  ;;  %vm1592_vm0 = vcmp.eq.s32.totalorder %v909_v13, 1 }
  0x90   :  { %vm363_vm8 = vcmp.eq.s32.totalorder %v357_v28, 1  ;;  %v683_v4 = vunpack.i.h.bf16 %v681_v1  ;;  %v682_v5 = vunpack.i.l.bf16 %v681_v1 }
  0x91   :  { %vm387_vm12 = vmand %vm1584_vm11, %vm363_vm8 }
  0x92   :  { %v391_v7 = vsel %vm387_vm12, 0.5, %v379_v63  ;;  %vm423_vm14 = vcmp.eq.s32.totalorder %v683_v4, 1  ;;  %vm422_vm2 = vcmp.eq.s32.totalorder %v682_v5, 1  ;;  %vm497_vm11 = vmor %vm1305_vm1, %vm1283_vm4 }
  0x93   :  { %vm428_vm9 = vmand %vm422_vm2, %vm1271_vm13  ;;  %v484_v8 = vpop.permute.xlu1 %483  ;;  %v456_v0 = vpop.permute.xlu0 %455 }
  0x94   :  { %vm429_vm10 = vmand %vm423_vm14, %vm1271_vm13  ;;  %v432_v9 = vsel %vm428_vm9, 1.0, %v369_v43  ;;  %vm490_vm8 = vcmp.eq.s32.totalorder %v484_v8, 1  ;;  %vm462_vm6 = vcmp.eq.s32.totalorder %v456_v0, 1 }
  0x95   :  { %v433_v59 = vsel %vm429_vm10, 1.0, %v390_v62  ;;  %vm496_vm12 = vmor %vm1277_vm7, %vm1291_vm3  ;;  %vm306_vm7 = vcmp.gt.f32.partialorder %v302_v19, 0.6  ;;  %vm1600_vm3 = vcmp.eq.s32.totalorder %v909_v13, 0 }
  0x96   :  { %vm1319_vm5 = vmand %vm1592_vm0, %vm490_vm8  ;;  %v645_v31 = vsel %vm306_vm7, 1.0, %v807_v24 }
  0x97   :  { %v686_v51 = vpop.permute.xlu0 %685  ;;  %v418_v63 = vpop.permute.xlu1 %417  ;;  %vm1597_vm9 = vmmov %vm1589_vm15  ;;  %vm528_vm15 = vcmask 64512  }
  0x98   :  { %v688_v14 = vunpack.i.h.bf16 %v686_v51  ;;  %v687_v15 = vunpack.i.l.bf16 %v686_v51  ;;  %vm424_vm14 = vcmp.eq.s32.totalorder %v418_v63, 1  ;;  %vm1331_vm10 = vmand %vm1597_vm9, %vm462_vm6 }
  0x99   :  { %vm1325_vm2 = vmand %vm424_vm14, %vm1271_vm13 }
  0x9a   :  { %vm517_vm8 = vcmp.eq.s32.totalorder %v688_v14, 1  ;;  %vm516_vm0 = vcmp.eq.s32.totalorder %v687_v15, 1  ;;  %v434_v18 = vsel %vm1325_vm2, 1.0, %v391_v7  ;;  %vm498_vm4 = vmor %vm1331_vm10, %vm1319_vm5 }
  0x9b   :  { %vm520_vm14 = vmand %vm516_vm0, %vm496_vm12  ;;  %v459_v20 = vpop.permute.xlu0 %458  ;;  %v487_v21 = vpop.permute.xlu1 %486 }
  0x9c   :  { %vm521_vm6 = vmand %vm517_vm8, %vm497_vm11  ;;  %v524_v22 = vsel %vm520_vm14, 1.0, %v432_v9  ;;  %vm463_vm2 = vcmp.eq.s32.totalorder %v459_v20, 1  ;;  %vm491_vm9 = vcmp.eq.s32.totalorder %v487_v21, 1  ;;  %vm1603_vm11 = vcmp.eq.s32.totalorder %v909_v13, 1 }
  0x9d   :  { %v525_v23 = vsel %vm521_vm6, 1.0, %v433_v59  ;;  %529 = vst.msk [vmem:[%s1473_s9] sm:$0xff] %vm528_vm15, %v524_v22  ;;  %v533_v3 = vmul.f32 2.0, %v524_v22  ;;  %vm1364_vm1 = vmand %vm1600_vm3, %vm463_vm2 }
  0x9e   :  { %530 = vst.msk [vmem:[%s1473_s9 + $0x8] sm:$0xff] %vm528_vm15, %v525_v23  ;;  %v534_v25 = vmul.f32 2.0, %v525_v23  ;;  %vm1371_vm12 = vmand %vm1603_vm11, %vm491_vm9 }
  0x9f   :  { %v512_v26 = vpop.permute.xlu0 %511  ;;  %v421_v27 = vpop.permute.xlu1 %420  ;;  %v541_v29 = vsel %vm528_vm15, %v533_v3, 0.0  ;;  %vm499_vm14 = vmor %vm1364_vm1, %vm1371_vm12 }
  0xa0   :  { %vm518_vm8 = vcmp.eq.s32.totalorder %v512_v26, 1  ;;  %vm425_vm5 = vcmp.eq.s32.totalorder %v421_v27, 1  ;;  %v542_v32 = vsel %vm528_vm15, %v534_v25, 0.0 }
  0xa1   :  { %vm522_vm10 = vmand %vm518_vm8, %vm498_vm4  ;;  %v543_v33 = vadd.f32 %v542_v32, %v541_v29 }
  0xa2   :  { %v526_v34 = vsel %vm522_vm10, 1.0, %v434_v18  ;;  %vm431_vm0 = vmand %vm425_vm5, %vm1271_vm13 }
  0xa3   :  { %531 = vst.msk [vmem:[%s1473_s9 + $0x10] sm:$0xff] %vm528_vm15, %v526_v34  ;;  %v535_v13 = vmul.f32 2.0, %v526_v34  ;;  %v435_v35 = vsel %vm431_vm0, 1.0, %v645_v31  ;;  %v515_v36 = vpop.permute.xlu0 %514 }
  0xa4   :  { %vm519_vm6 = vcmp.eq.s32.totalorder %v515_v36, 1 }
  0xa5   :  { %vm523_vm2 = vmand %vm519_vm6, %vm499_vm14  ;;  %v544_v24 = vsel %vm528_vm15, %v535_v13, 0.0 }
  0xa6   :  { %v527_v37 = vsel %vm523_vm2, 1.0, %v435_v35  ;;  %v545_v38 = vadd.f32 %v544_v24, %v543_v33 }
  0xa7   :  { %532 = vst.msk [vmem:[%s1473_s9 + $0x18] sm:$0xff] %vm528_vm15, %v527_v37  ;;  %v536_v39 = vmul.f32 2.0, %v527_v37  ;;  %s808_s9 = smov [#allocation4]  }
  0xa8   :  { %s577_s30 = sshll.u32 %s808_s9, 4  ;;  %s578_s30 = int_to_ptr.vmem [resolvable:$true] %s577_s30 }
  0xa9   :  { %v546_v40 = vsel %vm528_vm15, %v536_v39, 0.0  ;;  %s689_s13 = scalar_lea.vmem %s578_s30, 512  ;;  %p694_p1 = scmp.lt.s32.totalorder %s578_s30, %s578_s30 }
  0xaa   :  { %v547_v41 = vadd.f32 %v546_v40, %v545_v38  ;;  %p690_p0 = scmp.ne.s32.totalorder %s578_s30, %s689_s13  ;;  %p695_p2 = scmp.lt.s32.totalorder %s689_s13, %s689_s13 }
  0xac   :  { %548 = vadd.xlane.f32.xlu0 %v547_v41  ;;  %p696_p3 = por %p695_p2, %p694_p1 }
  0xae   :  { %p697_p4 = pnand %p696_p3, %p690_p0 }
  0xd0   :  { %v288_v42 = vpop.xlane.xlu0 %287 }
  0xd1   :  { %v289_v44 = vrot.slane %v288_v42, 4  ;;  %v84_v45 = vpop.xlane.xlu1 %83 }
  0xd2   :  { %v85_v47 = vrot.slane %v84_v45, 4 }
  0xd3   :  { %v290_v52 = vadd.f32 %v289_v44, %v288_v42 }
  0xd4   :  { %v86_v53 = vadd.f32 %v85_v47, %v84_v45 }
  0xd5   :  { %v291_v54 = vrot.slane %v290_v52, 2 }
  0xd6   :  { %v87_v55 = vrot.slane %v86_v53, 2 }
  0xd7   :  { %v292_v57 = vadd.f32 %v291_v54, %v290_v52 }
  0xd8   :  { %v88_v58 = vadd.f32 %v87_v55, %v86_v53 }
  0xd9   :  { %v293_v60 = vrot.slane %v292_v57, 1 }
  0xda   :  { %v89_v61 = vrot.slane %v88_v58, 1 }
  0xdb   :  { %v294_v62 = vadd.f32 %v293_v60, %v292_v57 }
  0xdc   :  { %v90_v49 = vadd.f32 %v89_v61, %v88_v58 }
  0xde   :  { %646 = vpush %v90_v49 }
  0xdf   :  { %653 = vpush %v294_v62 }
  0xe0   :  { %700 = shalt.err (!%p697_p4)
}
  0xe1   :  { %s701_s16 = scalar_lea.hbm %s1472_s8, 512 }
  0xe2   :  { %p702_p5 = scmp.ne.s32.totalorder %s1472_s8, %s701_s16  ;;  %p705_p6 = scmp.lt.u32.totalorder %s701_s16, %s1472_s8 }
  0xe4   :  { %p707_p7 = pnand %p705_p6, %p702_p5 }
  0xe6   :  { %710 = shalt.err (!%p707_p7)
}
  0xe7   :  { %s809_s20 = smov 128   ;;  %s810_s21 = smov 8  }
  0xe8   :  { %583 = dma.vmem_to_hbm [thread:$0]  %s578_s30, 512, %s1472_s8, [#allocation5], %s809_s20, %s809_s20, %s810_s21  }
  0xe9   :  { %s811_s22 = smov [#allocation2]  }
  0xea   :  { %s565_s1 = sshll.u32 %s811_s22, 4  ;;  %s566_s1 = int_to_ptr.vmem [resolvable:$true] %s565_s1 }
  0xeb   :  { %s711_s3 = scalar_lea.vmem %s566_s1, 256  ;;  %p716_p9 = scmp.lt.s32.totalorder %s566_s1, %s566_s1 }
  0xec   :  { %p712_p8 = scmp.ne.s32.totalorder %s566_s1, %s711_s3  ;;  %p717_p10 = scmp.lt.s32.totalorder %s711_s3, %s711_s3 }
  0xee   :  { %p718_p11 = por %p717_p10, %p716_p9 }
  0xf0   :  { %p719_p12 = pnand %p718_p11, %p712_p8 }
  0xf2   :  { %722 = shalt.err (!%p719_p12)
}
  0xf3   :  { %s723_s4 = scalar_lea.hbm %s1471_s7, 256 }
  0xf4   :  { %p724_p13 = scmp.ne.s32.totalorder %s1471_s7, %s723_s4  ;;  %p727_p0 = scmp.lt.u32.totalorder %s723_s4, %s1471_s7 }
  0xf6   :  { %p729_p1 = pnand %p727_p0, %p724_p13 }
  0xf8   :  { %732 = shalt.err (!%p729_p1)
}
  0xf9   :  { %571 = dma.vmem_to_hbm [thread:$0]  %s566_s1, 256, %s1471_s7, [#allocation3], %s809_s20, %s809_s20, %s810_s21   ;;  %vm94_vm13 = vcmask 0  }
  0xfa   :  { %s812_s29 = smov [#allocation7]   ;;  %s813_s18 = smov [#allocation6]  }
  0xfb   :  { %s602_s9 = sshll.u32 %s812_s29, 4  ;;  %s592_s6 = sshll.u32 %s813_s18, 4  ;;  %s603_s9 = int_to_ptr.vmem [resolvable:$true] %s602_s9  ;;  %s1417_s6 = int_to_ptr.vmem [resolvable:$true] %s592_s6 }
  0xfc   :  { %s733_s7 = scalar_lea.vmem %s603_s9, 16  ;;  %s737_s20 = scalar_lea.vmem %s603_s9, 32 }
  0xfd   :  { %p734_p4 = scmp.ne.s32.totalorder %s603_s9, %s733_s7  ;;  %p738_p5 = scmp.lt.s32.totalorder %s603_s9, %s603_s9 }
  0xfe   :  { %p739_p6 = scmp.lt.s32.totalorder %s737_s20, %s733_s7 }
 0x100   :  { %p740_p7 = por %p739_p6, %p738_p5 }
 0x102   :  { %p741_p8 = pnand %p740_p7, %p734_p4 }
 0x10f   :  { %s647_s30 = spop %646 }
 0x110   :  { %p648_p2 = scmp.lt.s32.totalorder %s647_s30, 0  ;;  %s649_s13 = sceil.f32 %s647_s30 }
 0x111   :  { %s650_s14 = sfloor.f32 %s647_s30  ;;  %s654_s15 = spop %653 }
 0x112   :  { %p655_p3 = scmp.lt.s32.totalorder %s654_s15, 0  ;;  %s656_s16 = sceil.f32 %s654_s15 }
 0x113   :  { %s657_s17 = sfloor.f32 %s654_s15  ;;  %s1609_s13 = smov (!%p648_p2, %s649_s13), %s650_s14 }
 0x114   :  { %s1607_s16 = smov (!%p655_p3, %s656_s16), %s657_s17  ;;  %s652_s0 = scvt.f32.s32 %s1609_s13 }
 0x115   :  { %s659_s19 = scvt.f32.s32 %s1607_s16 }
 0x116   :  { %v93_v46 = vstv %s652_s0 }
 0x117   :  { %v297_v43 = vstv %s659_s19 }
 0x118   :  { %298 = vst.msk [vmem:[#allocation7] sm:$0x1] %vm94_vm13, %v297_v43 }
 0x119   :  { %744 = shalt.err (!%p741_p8)
}
 0x11a   :  { %s745_s22 = scalar_lea.hbm %s1475_s11, 16 }
 0x11b   :  { %p746_p9 = scmp.ne.s32.totalorder %s1475_s11, %s745_s22  ;;  %p749_p10 = scmp.lt.u32.totalorder %s745_s22, %s1475_s11 }
 0x11d   :  { %p751_p11 = pnand %p749_p10, %p746_p9 }
 0x11f   :  { %754 = shalt.err (!%p751_p11)
}
 0x120   :  { %605 = dma.vmem_to_hbm [thread:$0]  %s603_s9, 16, %s1475_s11, [#allocation8]   ;;  %95 = vst.msk [vmem:[#allocation6] sm:$0x1] %vm94_vm13, %v93_v46 }
 0x121   :  { %s755_s25 = scalar_lea.vmem %s1417_s6, 16  ;;  %s759_s26 = scalar_lea.vmem %s1417_s6, 32 }
 0x122   :  { %p756_p12 = scmp.ne.s32.totalorder %s1417_s6, %s755_s25  ;;  %p760_p13 = scmp.lt.s32.totalorder %s1417_s6, %s1417_s6 }
 0x123   :  { %p761_p0 = scmp.lt.s32.totalorder %s759_s26, %s755_s25 }
 0x125   :  { %p762_p1 = por %p761_p0, %p760_p13 }
 0x127   :  { %p763_p2 = pnand %p762_p1, %p756_p12 }
 0x129   :  { %766 = shalt.err (!%p763_p2)
}
 0x12a   :  { %s767_s28 = scalar_lea.hbm %s1474_s10, 16 }
 0x12b   :  { %p768_p3 = scmp.ne.s32.totalorder %s1474_s10, %s767_s28  ;;  %p771_p4 = scmp.lt.u32.totalorder %s767_s28, %s1474_s10 }
 0x12d   :  { %p773_p5 = pnand %p771_p4, %p768_p3 }
 0x12f   :  { %776 = shalt.err (!%p773_p5)
}
 0x130   :  { %595 = dma.vmem_to_hbm [thread:$0]  %s1417_s6, 16, %s1474_s10, [#allocation5]  }
 0x131   :  { %s814_s18 = smov [#allocation9]  }
 0x132   :  { %s612_s19 = sshll.u32 %s814_s18, 4  ;;  %s613_s19 = int_to_ptr.vmem [resolvable:$true] %s612_s19 }
 0x133   :  { %s777_s10 = scalar_lea.vmem %s613_s19, 16  ;;  %s781_s6 = scalar_lea.vmem %s613_s19, 32 }
 0x134   :  { %p778_p7 = scmp.ne.s32.totalorder %s613_s19, %s777_s10  ;;  %p782_p8 = scmp.lt.s32.totalorder %s613_s19, %s613_s19 }
 0x135   :  { %p783_p9 = scmp.lt.s32.totalorder %s781_s6, %s777_s10 }
 0x137   :  { %p784_p10 = por %p783_p9, %p782_p8 }
 0x139   :  { %v549_v48 = vpop.xlane.xlu0 %548  ;;  %p785_p11 = pnand %p784_p10, %p778_p7 }
 0x13a   :  { %v550_v50 = vrot.slane %v549_v48, 4 }
 0x13c   :  { %v551_v56 = vadd.f32 %v550_v50, %v549_v48 }
 0x13e   :  { %v552_v28 = vrot.slane %v551_v56, 2 }
 0x140   :  { %v553_v1 = vadd.f32 %v552_v28, %v551_v56 }
 0x142   :  { %v554_v2 = vrot.slane %v553_v1, 1 }
 0x144   :  { %v555_v4 = vadd.f32 %v554_v2, %v553_v1 }
 0x146   :  { %660 = vpush %v555_v4 }
 0x177   :  { %s661_s15 = spop %660 }
 0x178   :  { %p662_p6 = scmp.lt.s32.totalorder %s661_s15, 0  ;;  %s663_s16 = sceil.f32 %s661_s15 }
 0x179   :  { %s664_s17 = sfloor.f32 %s661_s15 }
 0x17a   :  { %s1611_s16 = smov (!%p662_p6, %s663_s16), %s664_s17 }
 0x17b   :  { %s666_s0 = scvt.f32.s32 %s1611_s16 }
 0x17d   :  { %v558_v5 = vstv %s666_s0 }
 0x17e   :  { %559 = vst.msk [vmem:[#allocation9] sm:$0x1] %vm94_vm13, %v558_v5 }
 0x17f   :  { %788 = shalt.err (!%p785_p11)
}
 0x180   :  { %s789_s21 = scalar_lea.hbm %s1476_s12, 16 }
 0x181   :  { %p790_p12 = scmp.ne.s32.totalorder %s1476_s12, %s789_s21  ;;  %p793_p13 = scmp.lt.u32.totalorder %s789_s21, %s1476_s12 }
 0x183   :  { %p795_p0 = pnand %p793_p13, %p790_p12 }
 0x185   :  { %798 = shalt.err (!%p795_p0)
}
 0x186   :  { %615 = dma.vmem_to_hbm [thread:$0]  %s613_s19, 16, %s1476_s12, [#allocation8]  }
 0x187   :  { %799 = dma.done.wait [#allocation3], 256  }
 0x188   :  { %800 = vsyncadd [#allocation3], 4294967040 }
 0x189   :  { %801 = dma.done.wait [#allocation5], 528  }
 0x18a   :  { %802 = vsyncadd [#allocation5], 4294966768 }
 0x18b   :  { %803 = dma.done.wait [#allocation8], 32  }
 0x18c   :  { %804 = vsyncadd [#allocation8], 4294967264 }
 0x18d   :  { %633 = vsyncpa [#allocation3], 1 }
 0x18e   :  { %634 = vsyncpa [#allocation5], 1 }
 0x18f   :  { %635 = vsyncpa [#allocation8], 1 }

</bundles_post_ra>
